<compile_context>
chip_gen: v7x
topology: tpu7x:2x2x1
jax: 0.10.0
libtpu: 0.0.40
codegen_flags: <defaults>
</compile_context>

<pallas_src>
import jax
import jax.numpy as jnp
from jax.experimental import pallas as pl
from jax.experimental.pallas import tpu as pltpu


NEG_SLOPE = 0.4


def _leaky_relu(x, slope=NEG_SLOPE):
    return jnp.where(x >= 0, x, slope * x)


def decoder_kernel(x_ref,
                   w1_ref, b1_ref,
                   w2_ref, b2_ref,
                   w3_ref, b3_ref,
                   w4_ref, b4_ref,
                   w5_ref, b5_ref,
                   o_ref):
    """Fused forward for one batch tile. Weights (bf16) and biases (f32) are VMEM-resident."""

    def dense(h, w_ref, b_ref):
        # bf16 x bf16 -> f32 accumulate on the MXU; bias added in f32 via implicit broadcast.
        return jnp.dot(h.astype(jnp.bfloat16), w_ref[...],
                       preferred_element_type=jnp.float32) + b_ref[...]

    h = x_ref[...].astype(jnp.float32)
    h = _leaky_relu(dense(h, w1_ref, b1_ref))
    h = _leaky_relu(dense(h, w2_ref, b2_ref))
    h = _leaky_relu(dense(h, w3_ref, b3_ref))
    h = _leaky_relu(dense(h, w4_ref, b4_ref))
    z = dense(h, w5_ref, b5_ref)
    # sigmoid(z) = 1 / (1 + exp(-z)); exp and reciprocal both land on the EUP slot.
    o_ref[...] = pl.reciprocal(1.0 + jnp.exp(-z), approx=True).astype(o_ref.dtype)


def _pick_batch_tile(batch):
    # MXU wants large M tiles (128 on v5e, 256 on v6e/v7x); keep >=2 grid steps for
    # v7x megacore when the batch is big enough, otherwise run the whole batch in one step.
    if batch >= 512:
        return 256
    if batch >= 256:
        return 128
    return batch


def decoder_forward(x, params, *, batch_tile=None):
    """x: (B, hidden_size[0]) f32. params: list of 5 (W, b) pairs, W stored as (in, out)."""
    B, in_dim = x.shape
    out_dim = params[-1][0].shape[1]
    # Pad the final layer to a lane-dense (multiple-of-128) width -> unmasked full-lane stores.
    out_pad = ((out_dim + 127) // 128) * 128

    if batch_tile is None:
        batch_tile = _pick_batch_tile(B)
    Bp = ((B + batch_tile - 1) // batch_tile) * batch_tile
    xp = x if Bp == B else jnp.pad(x, ((0, Bp - B), (0, 0)))

    # Flatten params into the pallas_call argument list: x, W1, b1, ..., W5, b5
    flat = []
    last = len(params) - 1
    for li, (w, b) in enumerate(params):
        if li == last and out_pad != out_dim:
            w = jnp.pad(w, ((0, 0), (0, out_pad - out_dim)))
            b = jnp.pad(b, (0, out_pad - out_dim))
        flat.append(w.astype(jnp.bfloat16))                 # MXU operands in bf16
        flat.append(b.reshape(1, -1).astype(jnp.float32))   # bias add stays f32

    def const_spec(arr):
        # Whole array resident in VMEM for every grid step (constant block index).
        return pl.BlockSpec(arr.shape, lambda i, _n=arr.ndim: (0,) * _n)

    in_specs = [pl.BlockSpec((batch_tile, in_dim), lambda i: (i, 0))]
    in_specs += [const_spec(a) for a in flat]
    out_spec = pl.BlockSpec((batch_tile, out_pad), lambda i: (i, 0))

    y = pl.pallas_call(
        decoder_kernel,
        out_shape=jax.ShapeDtypeStruct((Bp, out_pad), jnp.float32),
        grid_spec=pltpu.PrefetchScalarGridSpec(
            num_scalar_prefetch=0,
            grid=(Bp // batch_tile,),
            in_specs=in_specs,
            out_specs=out_spec,
        ),
        compiler_params=pltpu.CompilerParams(
            dimension_semantics=("parallel",)),
        # TODO(synk): if hidden sizes are scaled up, single-buffer the constant weight
        # specs (pipeline_mode=pl.Buffered(1)) and re-derive the VMEM budget for v7x's
        # 64 MiB (vmem_limit_bytes); weights here are ~84 KB so it is irrelevant.
    )(xp, *flat)

    return y[:B, :out_dim]


def xavier_uniform(key, fan_in, fan_out, dtype=jnp.float32):
    # nn.init.xavier_uniform_ : U(-a, a), a = sqrt(6 / (fan_in + fan_out))
    bound = jnp.sqrt(6.0 / (fan_in + fan_out))
    return jax.random.uniform(key, (fan_in, fan_out), dtype=dtype,
                              minval=-bound, maxval=bound)


def make_params(key, hidden_size, output_size):
    dims = list(hidden_size) + [output_size]
    params = []
    for i in range(5):
        key, sub = jax.random.split(key)
        w = xavier_uniform(sub, dims[i], dims[i + 1])
        b = jnp.zeros((dims[i + 1],), jnp.float32)  # nn.init.constant_(bias, 0.0)
        params.append((w, b))
    return params


def decoder_reference(x, params, *, bf16_matmul=True):
    """Plain-JAX reference; bf16_matmul=True mirrors the kernel's MXU operand casts."""
    def dense(h, w, b):
        if bf16_matmul:
            return jnp.dot(h.astype(jnp.bfloat16), w.astype(jnp.bfloat16),
                           preferred_element_type=jnp.float32) + b
        return h @ w + b

    h = x
    for (w, b) in params[:4]:
        h = _leaky_relu(dense(h, w, b))
    w, b = params[4]
    return jax.nn.sigmoid(dense(h, w, b))


if __name__ == "__main__":
    # Small, module-consistent shapes: hidden_size has 5 entries, output_size is the final dim.
    hidden_size = [32, 64, 128, 64, 32]
    output_size = 16
    batch = 16

    key = jax.random.PRNGKey(0)
    key, xkey = jax.random.split(key)
    x = jax.random.normal(xkey, (batch, hidden_size[0]), jnp.float32)
    params = make_params(key, hidden_size, output_size)

    out = decoder_forward(x, params)
    out = jax.block_until_ready(out)
    assert out.shape == (batch, output_size)

    # Tight check vs the same bf16-operand / f32-accumulate math the kernel runs
    # (approx-reciprocal sigmoid contributes <~1e-3 abs on values in (0, 1)).
    ref_bf16 = decoder_reference(x, params, bf16_matmul=True)
    assert jnp.allclose(out, ref_bf16, atol=5e-3, rtol=0.0), "mismatch vs bf16 reference"

    # Loose semantic check vs the pure-f32 (PyTorch-equivalent) math.
    ref_f32 = decoder_reference(x, params, bf16_matmul=False)
    assert jnp.allclose(out, ref_f32, atol=5e-2, rtol=5e-2), "mismatch vs f32 reference"

    print("KERNEL_OK")
</pallas_src>

<mosaic_0001>
module attributes {stable_mosaic.version = 11 : i64} {
  func.func @decoder_kernel(%arg0: i32, %arg1: memref<16x32xf32, #tpu.memory_space<vmem>>, %arg2: memref<32x64xbf16, #tpu.memory_space<vmem>>, %arg3: memref<1x64xf32, #tpu.memory_space<vmem>>, %arg4: memref<64x128xbf16, #tpu.memory_space<vmem>>, %arg5: memref<1x128xf32, #tpu.memory_space<vmem>>, %arg6: memref<128x64xbf16, #tpu.memory_space<vmem>>, %arg7: memref<1x64xf32, #tpu.memory_space<vmem>>, %arg8: memref<64x32xbf16, #tpu.memory_space<vmem>>, %arg9: memref<1x32xf32, #tpu.memory_space<vmem>>, %arg10: memref<32x128xbf16, #tpu.memory_space<vmem>>, %arg11: memref<1x128xf32, #tpu.memory_space<vmem>>, %arg12: memref<16x128xf32, #tpu.memory_space<vmem>>) attributes {dimension_semantics = [#tpu.dimension_semantics<parallel>], iteration_bounds = array<i64: 1>, scalar_prefetch = 0 : i64, scratch_operands = 0 : i64, tpu.core_type = #tpu.core_type<tc>, window_params = [{transform_indices = @transform_0, window_bounds = array<i64: 16, 32>}, {pipeline_mode = #tpu.pipeline_mode<synchronous>, transform_indices = @transform_1, window_bounds = array<i64: 32, 64>}, {pipeline_mode = #tpu.pipeline_mode<synchronous>, transform_indices = @transform_2, window_bounds = array<i64: 1, 64>}, {pipeline_mode = #tpu.pipeline_mode<synchronous>, transform_indices = @transform_3, window_bounds = array<i64: 64, 128>}, {pipeline_mode = #tpu.pipeline_mode<synchronous>, transform_indices = @transform_4, window_bounds = array<i64: 1, 128>}, {pipeline_mode = #tpu.pipeline_mode<synchronous>, transform_indices = @transform_5, window_bounds = array<i64: 128, 64>}, {pipeline_mode = #tpu.pipeline_mode<synchronous>, transform_indices = @transform_6, window_bounds = array<i64: 1, 64>}, {pipeline_mode = #tpu.pipeline_mode<synchronous>, transform_indices = @transform_7, window_bounds = array<i64: 64, 32>}, {pipeline_mode = #tpu.pipeline_mode<synchronous>, transform_indices = @transform_8, window_bounds = array<i64: 1, 32>}, {pipeline_mode = #tpu.pipeline_mode<synchronous>, transform_indices = @transform_9, window_bounds = array<i64: 32, 128>}, {pipeline_mode = #tpu.pipeline_mode<synchronous>, transform_indices = @transform_10, window_bounds = array<i64: 1, 128>}, {transform_indices = @transform_11, window_bounds = array<i64: 16, 128>}]} {
    %c0 = arith.constant 0 : index
    %c0_0 = arith.constant 0 : index
    %0 = vector.load %arg1[%c0, %c0_0] : memref<16x32xf32, #tpu.memory_space<vmem>>, vector<16x32xf32>
    %1 = arith.truncf %0 : vector<16x32xf32> to vector<16x32xbf16>
    %c0_1 = arith.constant 0 : index
    %c0_2 = arith.constant 0 : index
    %2 = vector.load %arg2[%c0_1, %c0_2] : memref<32x64xbf16, #tpu.memory_space<vmem>>, vector<32x64xbf16>
    %cst = arith.constant dense<0.000000e+00> : vector<16x64xf32>
    %3 = tpu.matmul %1, %2, %cst {dimension_numbers = #tpu.dot_dimension_numbers<[1], [0], [0], [1], [0, 0, 1, 1], [], []>} : vector<16x32xbf16>, vector<32x64xbf16>, vector<16x64xf32> -> vector<16x64xf32>
    %c0_3 = arith.constant 0 : index
    %c0_4 = arith.constant 0 : index
    %4 = vector.load %arg3[%c0_3, %c0_4] : memref<1x64xf32, #tpu.memory_space<vmem>>, vector<1x64xf32>
    %5 = vector.broadcast %4 : vector<1x64xf32> to vector<16x64xf32>
    %6 = arith.addf %3, %5 : vector<16x64xf32>
    %cst_5 = arith.constant 0.000000e+00 : f32
    %7 = vector.broadcast %cst_5 : f32 to vector<16x64xf32>
    %8 = arith.cmpf oge, %6, %7 : vector<16x64xf32>
    %cst_6 = arith.constant 4.000000e-01 : f32
    %9 = vector.broadcast %cst_6 : f32 to vector<16x64xf32>
    %10 = arith.mulf %9, %6 : vector<16x64xf32>
    %11 = arith.select %8, %6, %10 : vector<16x64xi1>, vector<16x64xf32>
    %12 = arith.truncf %11 : vector<16x64xf32> to vector<16x64xbf16>
    %c0_7 = arith.constant 0 : index
    %c0_8 = arith.constant 0 : index
    %13 = vector.load %arg4[%c0_7, %c0_8] : memref<64x128xbf16, #tpu.memory_space<vmem>>, vector<64x128xbf16>
    %cst_9 = arith.constant dense<0.000000e+00> : vector<16x128xf32>
    %14 = tpu.matmul %12, %13, %cst_9 {dimension_numbers = #tpu.dot_dimension_numbers<[1], [0], [0], [1], [0, 0, 1, 1], [], []>} : vector<16x64xbf16>, vector<64x128xbf16>, vector<16x128xf32> -> vector<16x128xf32>
    %c0_10 = arith.constant 0 : index
    %c0_11 = arith.constant 0 : index
    %15 = vector.load %arg5[%c0_10, %c0_11] : memref<1x128xf32, #tpu.memory_space<vmem>>, vector<1x128xf32>
    %16 = vector.broadcast %15 : vector<1x128xf32> to vector<16x128xf32>
    %17 = arith.addf %14, %16 : vector<16x128xf32>
    %cst_12 = arith.constant 0.000000e+00 : f32
    %18 = vector.broadcast %cst_12 : f32 to vector<16x128xf32>
    %19 = arith.cmpf oge, %17, %18 : vector<16x128xf32>
    %cst_13 = arith.constant 4.000000e-01 : f32
    %20 = vector.broadcast %cst_13 : f32 to vector<16x128xf32>
    %21 = arith.mulf %20, %17 : vector<16x128xf32>
    %22 = arith.select %19, %17, %21 : vector<16x128xi1>, vector<16x128xf32>
    %23 = arith.truncf %22 : vector<16x128xf32> to vector<16x128xbf16>
    %c0_14 = arith.constant 0 : index
    %c0_15 = arith.constant 0 : index
    %24 = vector.load %arg6[%c0_14, %c0_15] : memref<128x64xbf16, #tpu.memory_space<vmem>>, vector<128x64xbf16>
    %cst_16 = arith.constant dense<0.000000e+00> : vector<16x64xf32>
    %25 = tpu.matmul %23, %24, %cst_16 {dimension_numbers = #tpu.dot_dimension_numbers<[1], [0], [0], [1], [0, 0, 1, 1], [], []>} : vector<16x128xbf16>, vector<128x64xbf16>, vector<16x64xf32> -> vector<16x64xf32>
    %c0_17 = arith.constant 0 : index
    %c0_18 = arith.constant 0 : index
    %26 = vector.load %arg7[%c0_17, %c0_18] : memref<1x64xf32, #tpu.memory_space<vmem>>, vector<1x64xf32>
    %27 = vector.broadcast %26 : vector<1x64xf32> to vector<16x64xf32>
    %28 = arith.addf %25, %27 : vector<16x64xf32>
    %cst_19 = arith.constant 0.000000e+00 : f32
    %29 = vector.broadcast %cst_19 : f32 to vector<16x64xf32>
    %30 = arith.cmpf oge, %28, %29 : vector<16x64xf32>
    %cst_20 = arith.constant 4.000000e-01 : f32
    %31 = vector.broadcast %cst_20 : f32 to vector<16x64xf32>
    %32 = arith.mulf %31, %28 : vector<16x64xf32>
    %33 = arith.select %30, %28, %32 : vector<16x64xi1>, vector<16x64xf32>
    %34 = arith.truncf %33 : vector<16x64xf32> to vector<16x64xbf16>
    %c0_21 = arith.constant 0 : index
    %c0_22 = arith.constant 0 : index
    %35 = vector.load %arg8[%c0_21, %c0_22] : memref<64x32xbf16, #tpu.memory_space<vmem>>, vector<64x32xbf16>
    %cst_23 = arith.constant dense<0.000000e+00> : vector<16x32xf32>
    %36 = tpu.matmul %34, %35, %cst_23 {dimension_numbers = #tpu.dot_dimension_numbers<[1], [0], [0], [1], [0, 0, 1, 1], [], []>} : vector<16x64xbf16>, vector<64x32xbf16>, vector<16x32xf32> -> vector<16x32xf32>
    %c0_24 = arith.constant 0 : index
    %c0_25 = arith.constant 0 : index
    %37 = vector.load %arg9[%c0_24, %c0_25] : memref<1x32xf32, #tpu.memory_space<vmem>>, vector<1x32xf32>
    %38 = vector.broadcast %37 : vector<1x32xf32> to vector<16x32xf32>
    %39 = arith.addf %36, %38 : vector<16x32xf32>
    %cst_26 = arith.constant 0.000000e+00 : f32
    %40 = vector.broadcast %cst_26 : f32 to vector<16x32xf32>
    %41 = arith.cmpf oge, %39, %40 : vector<16x32xf32>
    %cst_27 = arith.constant 4.000000e-01 : f32
    %42 = vector.broadcast %cst_27 : f32 to vector<16x32xf32>
    %43 = arith.mulf %42, %39 : vector<16x32xf32>
    %44 = arith.select %41, %39, %43 : vector<16x32xi1>, vector<16x32xf32>
    %45 = arith.truncf %44 : vector<16x32xf32> to vector<16x32xbf16>
    %c0_28 = arith.constant 0 : index
    %c0_29 = arith.constant 0 : index
    %46 = vector.load %arg10[%c0_28, %c0_29] : memref<32x128xbf16, #tpu.memory_space<vmem>>, vector<32x128xbf16>
    %cst_30 = arith.constant dense<0.000000e+00> : vector<16x128xf32>
    %47 = tpu.matmul %45, %46, %cst_30 {dimension_numbers = #tpu.dot_dimension_numbers<[1], [0], [0], [1], [0, 0, 1, 1], [], []>} : vector<16x32xbf16>, vector<32x128xbf16>, vector<16x128xf32> -> vector<16x128xf32>
    %c0_31 = arith.constant 0 : index
    %c0_32 = arith.constant 0 : index
    %48 = vector.load %arg11[%c0_31, %c0_32] : memref<1x128xf32, #tpu.memory_space<vmem>>, vector<1x128xf32>
    %49 = vector.broadcast %48 : vector<1x128xf32> to vector<16x128xf32>
    %50 = arith.addf %47, %49 : vector<16x128xf32>
    %cst_33 = arith.constant 0.000000e+00 : f32
    %51 = vector.broadcast %cst_33 : f32 to vector<16x128xf32>
    %52 = arith.subf %51, %50 : vector<16x128xf32>
    %53 = math.exp %52 : vector<16x128xf32>
    %cst_34 = arith.constant 1.000000e+00 : f32
    %54 = vector.broadcast %cst_34 : f32 to vector<16x128xf32>
    %55 = arith.addf %54, %53 : vector<16x128xf32>
    %56 = tpu.reciprocal %55 {approx = true} : vector<16x128xf32> -> vector<16x128xf32>
    %c0_35 = arith.constant 0 : index
    %c0_36 = arith.constant 0 : index
    %57 = vector.load %arg12[%c0_35, %c0_36] : memref<16x128xf32, #tpu.memory_space<vmem>>, vector<16x128xf32>
    tpu.vector_store %arg12[%c0_35, %c0_36], %56 {strides = array<i32>} : memref<16x128xf32, #tpu.memory_space<vmem>>, vector<16x128xf32>,
    return
  }
  func.func @transform_0(%arg0: i32) -> (i32, i32) {
    %c0_i32 = arith.constant 0 : i32
    %c0_i32_0 = arith.constant 0 : i32
    return %arg0, %c0_i32 : i32, i32
  }
  func.func @transform_1(%arg0: i32) -> (i32, i32) {
    %c0_i32 = arith.constant 0 : i32
    %c0_i32_0 = arith.constant 0 : i32
    %c0_i32_1 = arith.constant 0 : i32
    return %c0_i32, %c0_i32_0 : i32, i32
  }
  func.func @transform_2(%arg0: i32) -> (i32, i32) {
    %c0_i32 = arith.constant 0 : i32
    %c0_i32_0 = arith.constant 0 : i32
    %c0_i32_1 = arith.constant 0 : i32
    return %c0_i32, %c0_i32_0 : i32, i32
  }
  func.func @transform_3(%arg0: i32) -> (i32, i32) {
    %c0_i32 = arith.constant 0 : i32
    %c0_i32_0 = arith.constant 0 : i32
    %c0_i32_1 = arith.constant 0 : i32
    return %c0_i32, %c0_i32_0 : i32, i32
  }
  func.func @transform_4(%arg0: i32) -> (i32, i32) {
    %c0_i32 = arith.constant 0 : i32
    %c0_i32_0 = arith.constant 0 : i32
    %c0_i32_1 = arith.constant 0 : i32
    return %c0_i32, %c0_i32_0 : i32, i32
  }
  func.func @transform_5(%arg0: i32) -> (i32, i32) {
    %c0_i32 = arith.constant 0 : i32
    %c0_i32_0 = arith.constant 0 : i32
    %c0_i32_1 = arith.constant 0 : i32
    return %c0_i32, %c0_i32_0 : i32, i32
  }
  func.func @transform_6(%arg0: i32) -> (i32, i32) {
    %c0_i32 = arith.constant 0 : i32
    %c0_i32_0 = arith.constant 0 : i32
    %c0_i32_1 = arith.constant 0 : i32
    return %c0_i32, %c0_i32_0 : i32, i32
  }
  func.func @transform_7(%arg0: i32) -> (i32, i32) {
    %c0_i32 = arith.constant 0 : i32
    %c0_i32_0 = arith.constant 0 : i32
    %c0_i32_1 = arith.constant 0 : i32
    return %c0_i32, %c0_i32_0 : i32, i32
  }
  func.func @transform_8(%arg0: i32) -> (i32, i32) {
    %c0_i32 = arith.constant 0 : i32
    %c0_i32_0 = arith.constant 0 : i32
    %c0_i32_1 = arith.constant 0 : i32
    return %c0_i32, %c0_i32_0 : i32, i32
  }
  func.func @transform_9(%arg0: i32) -> (i32, i32) {
    %c0_i32 = arith.constant 0 : i32
    %c0_i32_0 = arith.constant 0 : i32
    %c0_i32_1 = arith.constant 0 : i32
    return %c0_i32, %c0_i32_0 : i32, i32
  }
  func.func @transform_10(%arg0: i32) -> (i32, i32) {
    %c0_i32 = arith.constant 0 : i32
    %c0_i32_0 = arith.constant 0 : i32
    %c0_i32_1 = arith.constant 0 : i32
    return %c0_i32, %c0_i32_0 : i32, i32
  }
  func.func @transform_11(%arg0: i32) -> (i32, i32) {
    %c0_i32 = arith.constant 0 : i32
    %c0_i32_0 = arith.constant 0 : i32
    return %arg0, %c0_i32 : i32, i32
  }
}

</mosaic_0001>

<bundles_post_ra>
// kernel: tpu_custom_call.1
= control target key start
LH: loop header
LB: loop body
LE: loop exit
PB: predicated region body
PF: predicated region fallthrough
CT: control target
= control target key end

     0   :  { %v684_v1 = vmov 0.0   ;;  %vm685_vm0 = vmmov 0   ;;  %vm66_vm1 = vcmask 261120   ;;  %s876_s0 = inlined_call_operand.vmem [shape: f32[16,32], index: 0, kind: input, shape index: {}]   ;;  %s877_s1 = inlined_call_operand.vmem [shape: bf16[32,64], index: 1, kind: input, shape index: {}]   ;;  %s878_s2 = inlined_call_operand.vmem [shape: f32[1,64], index: 2, kind: input, shape index: {}]   ;;  %s879_s3 = inlined_call_operand.vmem [shape: bf16[64,128], index: 3, kind: input, shape index: {}]   ;;  %s880_s4 = inlined_call_operand.vmem [shape: f32[1,128], index: 4, kind: input, shape index: {}]   ;;  %s881_s5 = inlined_call_operand.vmem [shape: bf16[128,64], index: 5, kind: input, shape index: {}]   ;;  %s882_s6 = inlined_call_operand.vmem [shape: f32[1,64], index: 6, kind: input, shape index: {}]   ;;  %s883_s7 = inlined_call_operand.vmem [shape: bf16[64,32], index: 7, kind: input, shape index: {}]   ;;  %s884_s8 = inlined_call_operand.vmem [shape: f32[1,32], index: 8, kind: input, shape index: {}]   ;;  %s885_s9 = inlined_call_operand.vmem [shape: bf16[32,128], index: 9, kind: input, shape index: {}]   ;;  %s886_s10 = inlined_call_operand.vmem [shape: f32[1,128], index: 10, kind: input, shape index: {}]   ;;  %s887_s11 = inlined_call_operand.hbm [shape: f32[16,128], index: 11, kind: output, shape index: {}]  }
   0x1   :  { %v632_v0 = vld [vmem:[%s877_s1] sm:$0xff]   ;;  %567 = vmatprep.subr.bf16.mxu0 %v684_v1  ;;  %v633_v2 = vld [vmem:[%s877_s1 + $0x8] sm:$0xff]   ;;  %575 = vmatprep.subr.bf16.mxu1 %v684_v1 }
   0x2   :  { %568 = vmatpush3.bf16.msra.mxu0 %v632_v0  ;;  %571 = vmatprep.mubr.msk.bf16.mxu0 %vm685_vm0, %v684_v1  ;;  %v40_v3 = vld [vmem:[%s876_s0] sm:$0xff]  ;;  %v41_v4 = vld [vmem:[%s876_s0 + $0x8] sm:$0xff] }
   0x3   :  { %569 = vmatprep.subr.bf16.mxu0 %v684_v1  ;;  %v634_v5 = vld [vmem:[%s879_s3] sm:$0xff]   ;;  %583 = vmatprep.mubr.msk.bf16.mxu1 %vm685_vm0, %v684_v1  ;;  %v635_v6 = vld [vmem:[%s879_s3 + $0x8] sm:$0xff]   ;;  %v42_v7 = vpack.c.bf16 %v41_v4, %v40_v3 }
   0x4   :  { %576 = vmatpush3.bf16.msra.mxu1 %v634_v5 }
   0x5   :  { %577 = vmatprep.subr.bf16.mxu1 %v684_v1 }
   0x6   :  { %570 = vmatpush3.bf16.msra.mxu0 %v633_v2 }
   0x7   :  { %587 = vmatprep.subr.bf16.mxu0 %v684_v1 }
   0x8   :  { %578 = vmatpush3.bf16.msra.mxu1 %v635_v6 }
   0x9   :  { %572 = vmatmul.mubr.msk.bf16.vlgmr.msra.gmra.mrb[0].mxu0 %vm66_vm1, %v42_v7  ;;  %579 = vmatprep.subr.bf16.mxu1 %v684_v1 }
   0xa   :  { %603 = vmatprep.mubr.msk.bf16.mxu0 %vm685_vm0, %v684_v1 }
   0xb   :  { %16 = vsyncpa [#allocation3], 0  ;;  %v636_v8 = vld [vmem:[%s879_s3 + $0x10] sm:$0xff]   ;;  %v637_v9 = vld [vmem:[%s879_s3 + $0x18] sm:$0xff]   ;;  %vm157_vm4 = vcmask 523264  }
   0xc   :  { %580 = vmatpush3.bf16.msra.mxu1 %v636_v8  ;;  %v638_v10 = vld [vmem:[%s881_s5] sm:$0xff]   ;;  %v639_v11 = vld [vmem:[%s881_s5 + $0x8] sm:$0xff]   ;;  %v640_v12 = vld [vmem:[%s881_s5 + $0x10] sm:$0xff]  }
   0xd   :  { %581 = vmatprep.subr.bf16.mxu1 %v684_v1  ;;  %588 = vmatpush3.bf16.msra.mxu0 %v638_v10  ;;  %v641_v13 = vld [vmem:[%s881_s5 + $0x18] sm:$0xff]   ;;  %v642_v14 = vld [vmem:[%s881_s5 + $0x20] sm:$0xff]   ;;  %v643_v15 = vld [vmem:[%s881_s5 + $0x28] sm:$0xff]  }
   0xe   :  { %589 = vmatprep.subr.bf16.mxu0 %v684_v1  ;;  %v513_v16 = vld [vmem:[%s878_s2] ss:$0 sm:$0xff]  ;;  %v644_v28 = vld [vmem:[%s881_s5 + $0x30] sm:$0xff]   ;;  %v645_v29 = vld [vmem:[%s881_s5 + $0x38] sm:$0xff]  }
   0xf   :  { %v646_v30 = vld [vmem:[%s883_s7] sm:$0xff]   ;;  %v647_v31 = vld [vmem:[%s883_s7 + $0x8] sm:$0xff]   ;;  %v648_v44 = vld [vmem:[%s883_s7 + $0x10] sm:$0xff]  }
  0x10   :  { %582 = vmatpush3.bf16.msra.mxu1 %v637_v9  ;;  %v517_v32 = vld [vmem:[%s880_s4] ss:$0 sm:$0xff]  ;;  %v649_v45 = vld [vmem:[%s883_s7 + $0x18] sm:$0xff]   ;;  %v651_v59 = vld [vmem:[%s885_s9 + $0x8] sm:$0xff]  }
  0x11   :  { %607 = vmatprep.subr.bf16.mxu1 %v684_v1  ;;  %590 = vmatpush3.bf16.msra.mxu0 %v639_v11  ;;  %v523_v46 = vld [vmem:[%s882_s6] ss:$0 sm:$0xff] }
  0x12   :  { %591 = vmatprep.subr.bf16.mxu0 %v684_v1  ;;  %v650_v58 = vld [vmem:[%s885_s9] sm:$0xff]  }
  0x13   :  { %v532_v60 = vld [vmem:[%s884_s8] ss:$0 sm:$0xff]  ;;  %s686_s8 = smov [#allocation2]  }
  0x14   :  { %v538_v8 = vld [vmem:[%s886_s10] ss:$0 sm:$0xff]  ;;  %s502_s10 = sshll.u32 %s686_s8, 4  ;;  %s503_s10 = int_to_ptr.vmem [resolvable:$true] %s502_s10 }
  0x15   :  { %592 = vmatpush3.bf16.msra.mxu0 %v640_v12  ;;  %s660_s21 = scalar_lea.vmem %s503_s10, 256  ;;  %p665_p1 = scmp.lt.s32.totalorder %s503_s10, %s503_s10 }
  0x16   :  { %593 = vmatprep.subr.bf16.mxu0 %v684_v1  ;;  %p661_p0 = scmp.ne.s32.totalorder %s503_s10, %s660_s21  ;;  %p666_p2 = scmp.lt.s32.totalorder %s660_s21, %s660_s21 }
  0x18   :  { %p667_p3 = por %p666_p2, %p665_p1 }
  0x19   :  { %594 = vmatpush3.bf16.msra.mxu0 %v641_v13 }
  0x1a   :  { %595 = vmatprep.subr.bf16.mxu0 %v684_v1  ;;  %p668_p4 = pnand %p667_p3, %p661_p0 }
  0x1d   :  { %596 = vmatpush3.bf16.msra.mxu0 %v642_v14 }
  0x1e   :  { %597 = vmatprep.subr.bf16.mxu0 %v684_v1 }
  0x21   :  { %598 = vmatpush3.bf16.msra.mxu0 %v643_v15 }
  0x22   :  { %599 = vmatprep.subr.bf16.mxu0 %v684_v1 }
  0x25   :  { %600 = vmatpush3.bf16.msra.mxu0 %v644_v28 }
  0x26   :  { %601 = vmatprep.subr.bf16.mxu0 %v684_v1 }
  0x29   :  { %602 = vmatpush3.bf16.msra.mxu0 %v645_v29 }
  0xdc   :  { %v104_v17 = vpop.f32.mrb[0].mxu0 }
  0xdd   :  { %v105_v18 = vadd.f32 %v513_v16, %v104_v17  ;;  %v573_v19 = vpop.f32.mrb[1].mxu0 }
  0xde   :  { %v107_v20 = vpop.f32.mrb[2].mxu0 }
  0xdf   :  { %v113_v21 = vmul.f32 0.4, %v105_v18  ;;  %v108_v22 = vadd.f32 %v513_v16, %v107_v20  ;;  %v574_v23 = vpop.f32.mrb[3].mxu0  ;;  %vm111_vm2 = vcmp.ge.f32.partialorder %v105_v18, 0.0 }
  0xe1   :  { %vm112_vm3 = vcmp.ge.f32.partialorder %v108_v22, 0.0  ;;  %v114_v24 = vmul.f32 0.4, %v108_v22  ;;  %v115_v25 = vsel %vm111_vm2, %v105_v18, %v113_v21 }
  0xe3   :  { %v116_v26 = vsel %vm112_vm3, %v108_v22, %v114_v24 }
  0xe4   :  { %v117_v27 = vpack.c.bf16 %v116_v26, %v115_v25 }
  0xe6   :  { %584 = vmatmul.mubr.msk.bf16.vlgmr.msra.gmra.mrb[0].mxu1 %vm157_vm4, %v117_v27 }
  0xe7   :  { %615 = vmatprep.mubr.msk.bf16.mxu1 %vm685_vm0, %v684_v1  ;;  %608 = vmatpush3.bf16.msra.mxu1 %v646_v30 }
  0xe8   :  { %609 = vmatprep.subr.bf16.mxu1 %v684_v1 }
  0xeb   :  { %610 = vmatpush3.bf16.msra.mxu1 %v647_v31 }
  0xec   :  { %611 = vmatprep.subr.bf16.mxu1 %v684_v1 }
  0xef   :  { %612 = vmatpush3.bf16.msra.mxu1 %v648_v44 }
  0xf0   :  { %613 = vmatprep.subr.bf16.mxu1 %v684_v1 }
  0xf3   :  { %614 = vmatpush3.bf16.msra.mxu1 %v649_v45 }
  0xf4   :  { %619 = vmatprep.subr.bf16.mxu1 %v684_v1 }
 0x1b9   :  { %v195_v33 = vpop.f32.mrb[0].mxu1 }
 0x1ba   :  { %v196_v34 = vadd.f32 %v517_v32, %v195_v33  ;;  %v585_v35 = vpop.f32.mrb[1].mxu1 }
 0x1bb   :  { %v198_v36 = vpop.f32.mrb[2].mxu1 }
 0x1bc   :  { %v204_v37 = vmul.f32 0.4, %v196_v34  ;;  %v199_v38 = vadd.f32 %v517_v32, %v198_v36  ;;  %v586_v39 = vpop.f32.mrb[3].mxu1  ;;  %vm202_vm5 = vcmp.ge.f32.partialorder %v196_v34, 0.0 }
 0x1be   :  { %vm203_vm6 = vcmp.ge.f32.partialorder %v199_v38, 0.0  ;;  %v205_v40 = vmul.f32 0.4, %v199_v38  ;;  %v206_v41 = vsel %vm202_vm5, %v196_v34, %v204_v37 }
 0x1c0   :  { %v207_v42 = vsel %vm203_vm6, %v199_v38, %v205_v40 }
 0x1c1   :  { %v208_v43 = vpack.c.bf16 %v207_v42, %v206_v41 }
 0x1c3   :  { %604 = vmatmul.mubr.bf16.vlgmr.msra.gmra.mrb[4].mxu0 %v208_v43 }
 0x296   :  { %v314_v47 = vpop.f32.mrb[4].mxu0 }
 0x297   :  { %v315_v48 = vadd.f32 %v523_v46, %v314_v47  ;;  %v605_v49 = vpop.f32.mrb[5].mxu0 }
 0x298   :  { %v317_v50 = vpop.f32.mrb[6].mxu0 }
 0x299   :  { %v323_v51 = vmul.f32 0.4, %v315_v48  ;;  %v318_v52 = vadd.f32 %v523_v46, %v317_v50  ;;  %v606_v53 = vpop.f32.mrb[7].mxu0  ;;  %vm321_vm7 = vcmp.ge.f32.partialorder %v315_v48, 0.0 }
 0x29b   :  { %vm322_vm8 = vcmp.ge.f32.partialorder %v318_v52, 0.0  ;;  %v324_v54 = vmul.f32 0.4, %v318_v52  ;;  %v325_v55 = vsel %vm321_vm7, %v315_v48, %v323_v51 }
 0x29d   :  { %v326_v56 = vsel %vm322_vm8, %v318_v52, %v324_v54 }
 0x29e   :  { %v327_v57 = vpack.c.bf16 %v326_v56, %v325_v55 }
 0x2a0   :  { %616 = vmatmul.mubr.msk.bf16.vlgmr.msra.gmra.mrb[4].mxu1 %vm157_vm4, %v327_v57 }
 0x2a1   :  { %623 = vmatprep.mubr.msk.bf16.mxu1 %vm685_vm0, %v684_v1  ;;  %620 = vmatpush3.bf16.msra.mxu1 %v650_v58 }
 0x2a2   :  { %621 = vmatprep.subr.bf16.mxu1 %v684_v1 }
 0x2a5   :  { %622 = vmatpush3.bf16.msra.mxu1 %v651_v59 }
 0x373   :  { %v404_v61 = vpop.f32.mrb[4].mxu1 }
 0x374   :  { %v405_v62 = vadd.f32 %v532_v60, %v404_v61  ;;  %v617_v63 = vpop.f32.mrb[5].mxu1 }
 0x375   :  { %v407_v0 = vpop.f32.mrb[6].mxu1 }
 0x376   :  { %v413_v2 = vmul.f32 0.4, %v405_v62  ;;  %v408_v3 = vadd.f32 %v532_v60, %v407_v0  ;;  %v618_v4 = vpop.f32.mrb[7].mxu1  ;;  %vm411_vm9 = vcmp.ge.f32.partialorder %v405_v62, 0.0 }
 0x378   :  { %vm412_vm10 = vcmp.ge.f32.partialorder %v408_v3, 0.0  ;;  %v414_v5 = vmul.f32 0.4, %v408_v3  ;;  %v415_v1 = vsel %vm411_vm9, %v405_v62, %v413_v2 }
 0x37a   :  { %v416_v6 = vsel %vm412_vm10, %v408_v3, %v414_v5 }
 0x37b   :  { %v417_v7 = vpack.c.bf16 %v416_v6, %v415_v1 }
 0x37d   :  { %624 = vmatmul.mubr.msk.bf16.vlgmr.msra.gmra.mrb[8].mxu1 %vm66_vm1, %v417_v7 }
 0x450   :  { %v478_v9 = vpop.f32.mrb[8].mxu1 }
 0x451   :  { %v479_v10 = vadd.f32 %v538_v8, %v478_v9  ;;  %v625_v11 = vpop.f32.mrb[9].mxu1 }
 0x452   :  { %v481_v12 = vpop.f32.mrb[10].mxu1 }
 0x453   :  { %v485_v13 = vsub.f32 0.0, %v479_v10  ;;  %v482_v14 = vadd.f32 %v538_v8, %v481_v12  ;;  %v626_v15 = vpop.f32.mrb[11].mxu1 }
 0x455   :  { %v487_v16 = vmul.f32 1.442695, %v485_v13  ;;  %v486_v17 = vsub.f32 0.0, %v482_v14 }
 0x457   :  { %652 = vpow2.f32 %v487_v16  ;;  %v489_v18 = vmul.f32 1.442695, %v486_v17 }
 0x459   :  { %654 = vpow2.f32 %v489_v18 }
 0x461   :  { %v653_v19 = vpop.eup %652 }
 0x462   :  { %v491_v20 = vadd.f32 1.0, %v653_v19 }
 0x463   :  { %v655_v21 = vpop.eup %654 }
 0x464   :  { %656 = vrcp.f32 %v491_v20  ;;  %v492_v22 = vadd.f32 1.0, %v655_v21 }
 0x466   :  { %658 = vrcp.f32 %v492_v22 }
 0x46e   :  { %v657_v23 = vpop.eup %656 }
 0x46f   :  { %495 = vst [vmem:[#allocation2] sm:$0xff] %v657_v23 }
 0x470   :  { %v659_v24 = vpop.eup %658 }
 0x471   :  { %496 = vst [vmem:[#allocation2 + $0x8] sm:$0xff] %v659_v24 }
 0x472   :  { %671 = shalt.err (!%p668_p4)
}
 0x473   :  { %s672_s24 = scalar_lea.hbm %s887_s11, 256 }
 0x474   :  { %p673_p5 = scmp.ne.s32.totalorder %s887_s11, %s672_s24  ;;  %p676_p6 = scmp.lt.u32.totalorder %s672_s24, %s887_s11 }
 0x476   :  { %p678_p7 = pnand %p676_p6, %p673_p5 }
 0x478   :  { %681 = shalt.err (!%p678_p7)
}
 0x479   :  { %s687_s27 = smov 128   ;;  %s688_s0 = smov 8  }
 0x47a   :  { %508 = dma.vmem_to_hbm [thread:$0]  %s503_s10, 256, %s887_s11, [#allocation3], %s687_s27, %s687_s27, %s688_s0  }
 0x47b   :  { %682 = dma.done.wait [#allocation3], 256  }
 0x47c   :  { %683 = vsyncadd [#allocation3], 4294967040 }
 0x47d   :  { %512 = vsyncpa [#allocation3], 1 }

</bundles_post_ra>
